<compile_context>
chip_gen: v7x
topology: tpu7x:2x2x1
jax: 0.10.0
libtpu: 0.0.40
codegen_flags: <defaults>
</compile_context>

<pallas_src>
import jax
import jax.numpy as jnp
from jax.experimental import pallas as pl
from jax.experimental.pallas import tpu as pltpu

D_IN = 1000            # frozen VGG19-bn output
D_FC1, D_FC2 = 256, 64
D_OUT, D_OUT_PAD = 2, 128
BN_EPS = 1e-5
_MAX_TB = 1024         # batch-tile rows (multiple of 8); fits 32 MiB scoped VMEM
_VMEM_LIMIT = 32 * 1024 * 1024


def _round_up(n, m):
    return ((n + m - 1) // m) * m


def _choose_tile(b):
    """Pick the batch tile: big (amortize per-step overhead), but aim for
    >= 2 grid steps so the 'parallel' axis can use both TensorCores on v7x."""
    tb = _round_up(-(-b // 2), 8)          # ceil(b/2), sublane-aligned
    return max(8, min(_MAX_TB, tb))


def prefetch_head_kernel(x_ref,
                         w1_ref, p1_ref,
                         w2_ref, p2_ref,
                         w3_ref, b3_ref,
                         o_ref):
    """Fused head: fc1+sigmoid+BN1 -> fc2+sigmoid+BN2 -> fc3+relu+sigmoid.

    BatchNorm1d (eval mode) is folded into a per-feature affine y = h*s + t
    (s = gamma/sqrt(var+eps), t = beta - mean*s; folded in pack_params).
    Dropout is identity in eval mode.  p1/p2 stack [bias; bn_scale; bn_shift].
    fc1/fc2 run bf16 on the MXU with f32 accumulation; epilogues and fc3 stay f32.
    """
    # Stream f32 features, cast to bf16 in-kernel (no wrapper pad/cast pass).
    x = x_ref[...].astype(jnp.bfloat16)                        # (TB, 1000)

    # fc1 -> sigmoid -> (dropout: identity) -> batchnorm1
    h1 = jnp.dot(x, w1_ref[...], preferred_element_type=jnp.float32)
    h1 = jax.nn.sigmoid(h1 + p1_ref[0:1, :])
    h1 = h1 * p1_ref[1:2, :] + p1_ref[2:3, :]                  # (TB, 256) f32

    # fc2 -> sigmoid -> (dropout: identity) -> batchnorm2
    h2 = jnp.dot(h1.astype(jnp.bfloat16), w2_ref[...],
                 preferred_element_type=jnp.float32)
    h2 = jax.nn.sigmoid(h2 + p2_ref[0:1, :])
    h2 = h2 * p2_ref[1:2, :] + p2_ref[2:3, :]                  # (TB, 64) f32

    # fc3 (64 -> 2, zero-padded to 128 lanes) -> relu -> sigmoid.
    # Lane-dense (TB, 128) output block => unmasked full-width stores.
    h3 = jnp.dot(h2, w3_ref[...], preferred_element_type=jnp.float32)
    h3 = h3 + b3_ref[...]                                      # (TB, 128) f32
    o_ref[...] = jax.nn.sigmoid(jnp.maximum(h3, 0.0))


@jax.jit
def prefetch_net_forward(features, packed):
    """features: (B, 1000) output of the frozen baseline (f32 or bf16).
    packed: kernel-ready parameters from pack_params()."""
    b = features.shape[0]
    tb = _choose_tile(b)
    b_pad = _round_up(b, tb)
    if b_pad != b:
        # Only the batch axis is padded (small, sliced off below); the feature
        # axis is streamed at its native 1000 width.
        features = jnp.pad(features, ((0, b_pad - b), (0, 0)))

    const = lambda i: (0, 0)   # weights/biases/BN params: VMEM-resident
    in_specs = [
        pl.BlockSpec((tb, D_IN), lambda i: (i, 0)),            # x (batch-tiled)
        pl.BlockSpec((D_IN, D_FC1), const),                    # w1 (bf16)
        pl.BlockSpec((3, D_FC1), const),                       # [b1; s1; t1]
        pl.BlockSpec((D_FC1, D_FC2), const),                   # w2 (bf16)
        pl.BlockSpec((3, D_FC2), const),                       # [b2; s2; t2]
        pl.BlockSpec((D_FC2, D_OUT_PAD), const),               # w3 (lane-padded)
        pl.BlockSpec((1, D_OUT_PAD), const),                   # b3 (lane-padded)
    ]
    out_spec = pl.BlockSpec((tb, D_OUT_PAD), lambda i: (i, 0))

    out = pl.pallas_call(
        prefetch_head_kernel,
        out_shape=jax.ShapeDtypeStruct((b_pad, D_OUT_PAD), jnp.float32),
        grid=(b_pad // tb,),
        in_specs=in_specs,
        out_specs=out_spec,
        compiler_params=pltpu.CompilerParams(
            dimension_semantics=("parallel",),
            vmem_limit_bytes=_VMEM_LIMIT),
    )(features, packed["w1"], packed["p1"], packed["w2"], packed["p2"],
      packed["w3p"], packed["b3p"])
    return out[:b, :D_OUT]


# ----------------------------------------------------------------------------
# Parameter construction / packing (runs once, outside the jitted forward).
# ----------------------------------------------------------------------------
def _linear_init(key, fan_in, fan_out):
    # Matches torch.nn.Linear default init: U(-1/sqrt(fan_in), 1/sqrt(fan_in)).
    kw, kb = jax.random.split(key)
    bound = 1.0 / jnp.sqrt(fan_in)
    w = jax.random.uniform(kw, (fan_in, fan_out), jnp.float32, -bound, bound)
    b = jax.random.uniform(kb, (1, fan_out), jnp.float32, -bound, bound)
    return w, b


def _bn_fold(gamma, beta, running_mean, running_var, eps=BN_EPS):
    scale = gamma / jnp.sqrt(running_var + eps)
    shift = beta - running_mean * scale
    return scale[None, :], shift[None, :]


def init_params(key):
    k1, k2, k3 = jax.random.split(key, 3)
    w1, b1 = _linear_init(k1, D_IN, D_FC1)
    w2, b2 = _linear_init(k2, D_FC1, D_FC2)
    w3, b3 = _linear_init(k3, D_FC2, D_OUT)
    # BatchNorm1d defaults: gamma=1, beta=0, running_mean=0, running_var=1.
    s1, t1 = _bn_fold(jnp.ones(D_FC1), jnp.zeros(D_FC1),
                      jnp.zeros(D_FC1), jnp.ones(D_FC1))
    s2, t2 = _bn_fold(jnp.ones(D_FC2), jnp.zeros(D_FC2),
                      jnp.zeros(D_FC2), jnp.ones(D_FC2))
    return dict(w1=w1, b1=b1, bn1_scale=s1, bn1_shift=t1,
                w2=w2, b2=b2, bn2_scale=s2, bn2_shift=t2,
                w3=w3, b3=b3)


def pack_params(p):
    """One-time packing into kernel-ready operands (no per-call XLA passes)."""
    w1 = p["w1"].astype(jnp.bfloat16)                           # (1000, 256)
    w2 = p["w2"].astype(jnp.bfloat16)                           # (256, 64)
    p1 = jnp.concatenate([p["b1"], p["bn1_scale"], p["bn1_shift"]], axis=0)
    p2 = jnp.concatenate([p["b2"], p["bn2_scale"], p["bn2_shift"]], axis=0)
    w3p = jnp.zeros((D_FC2, D_OUT_PAD), jnp.float32).at[:, :D_OUT].set(p["w3"])
    b3p = jnp.zeros((1, D_OUT_PAD), jnp.float32).at[:, :D_OUT].set(p["b3"])
    return dict(w1=w1, p1=p1.astype(jnp.float32),
                w2=w2, p2=p2.astype(jnp.float32),
                w3p=w3p, b3p=b3p)


def reference_forward(features, p):
    """Pure-JAX reference with the same bf16-matmul / f32-epilogue numerics."""
    bf = jnp.bfloat16
    h1 = jnp.dot(features.astype(bf), p["w1"].astype(bf),
                 preferred_element_type=jnp.float32) + p["b1"]
    h1 = jax.nn.sigmoid(h1)
    h1 = h1 * p["bn1_scale"] + p["bn1_shift"]
    h2 = jnp.dot(h1.astype(bf), p["w2"].astype(bf),
                 preferred_element_type=jnp.float32) + p["b2"]
    h2 = jax.nn.sigmoid(h2)
    h2 = h2 * p["bn2_scale"] + p["bn2_shift"]
    h3 = h2 @ p["w3"] + p["b3"]
    return jax.nn.sigmoid(jnp.maximum(h3, 0.0))


if __name__ == "__main__":
    key = jax.random.PRNGKey(0)
    k_feat, k_params = jax.random.split(key)

    batch = 2
    # Stand-in for the frozen VGG19-bn output (B, 1000).
    features = jax.random.normal(k_feat, (batch, D_IN), jnp.float32)
    params = init_params(k_params)
    packed = pack_params(params)

    out = prefetch_net_forward(features, packed)
    out = jax.block_until_ready(out)

    ref = reference_forward(features, params)
    assert out.shape == (batch, D_OUT), out.shape
    assert jnp.allclose(out, ref, atol=2e-3, rtol=2e-3), (out, ref)

    print("KERNEL_OK")
</pallas_src>

<mosaic_0001>
module attributes {stable_mosaic.version = 11 : i64} {
  func.func @prefetch_head_kernel(%arg0: i32, %arg1: memref<8x1000xf32, #tpu.memory_space<vmem>>, %arg2: memref<1000x256xbf16, #tpu.memory_space<vmem>>, %arg3: memref<3x256xf32, #tpu.memory_space<vmem>>, %arg4: memref<256x64xbf16, #tpu.memory_space<vmem>>, %arg5: memref<3x64xf32, #tpu.memory_space<vmem>>, %arg6: memref<64x128xf32, #tpu.memory_space<vmem>>, %arg7: memref<1x128xf32, #tpu.memory_space<vmem>>, %arg8: memref<8x128xf32, #tpu.memory_space<vmem>>) attributes {dimension_semantics = [#tpu.dimension_semantics<parallel>], iteration_bounds = array<i64: 1>, scalar_prefetch = 0 : i64, scratch_operands = 0 : i64, tpu.core_type = #tpu.core_type<tc>, window_params = [{transform_indices = @transform_0, window_bounds = array<i64: 8, 1000>}, {pipeline_mode = #tpu.pipeline_mode<synchronous>, transform_indices = @transform_1, window_bounds = array<i64: 1000, 256>}, {pipeline_mode = #tpu.pipeline_mode<synchronous>, transform_indices = @transform_2, window_bounds = array<i64: 3, 256>}, {pipeline_mode = #tpu.pipeline_mode<synchronous>, transform_indices = @transform_3, window_bounds = array<i64: 256, 64>}, {pipeline_mode = #tpu.pipeline_mode<synchronous>, transform_indices = @transform_4, window_bounds = array<i64: 3, 64>}, {pipeline_mode = #tpu.pipeline_mode<synchronous>, transform_indices = @transform_5, window_bounds = array<i64: 64, 128>}, {pipeline_mode = #tpu.pipeline_mode<synchronous>, transform_indices = @transform_6, window_bounds = array<i64: 1, 128>}, {transform_indices = @transform_7, window_bounds = array<i64: 8, 128>}]} {
    %c0 = arith.constant 0 : index
    %c0_0 = arith.constant 0 : index
    %0 = vector.load %arg1[%c0, %c0_0] : memref<8x1000xf32, #tpu.memory_space<vmem>>, vector<8x1000xf32>
    %1 = arith.truncf %0 : vector<8x1000xf32> to vector<8x1000xbf16>
    %c0_1 = arith.constant 0 : index
    %c0_2 = arith.constant 0 : index
    %2 = vector.load %arg2[%c0_1, %c0_2] : memref<1000x256xbf16, #tpu.memory_space<vmem>>, vector<1000x256xbf16>
    %cst = arith.constant dense<0.000000e+00> : vector<8x256xf32>
    %3 = tpu.matmul %1, %2, %cst {dimension_numbers = #tpu.dot_dimension_numbers<[1], [0], [0], [1], [0, 0, 1, 1], [], []>} : vector<8x1000xbf16>, vector<1000x256xbf16>, vector<8x256xf32> -> vector<8x256xf32>
    %c0_3 = arith.constant 0 : index
    %c0_4 = arith.constant 0 : index
    %4 = vector.load %arg3[%c0_3, %c0_4] : memref<3x256xf32, #tpu.memory_space<vmem>>, vector<1x256xf32>
    %5 = vector.broadcast %4 : vector<1x256xf32> to vector<8x256xf32>
    %6 = arith.addf %3, %5 : vector<8x256xf32>
    %7 = arith.negf %6 : vector<8x256xf32>
    %8 = math.exp %7 : vector<8x256xf32>
    %cst_5 = arith.constant 1.000000e+00 : f32
    %9 = vector.broadcast %cst_5 : f32 to vector<8x256xf32>
    %10 = arith.addf %9, %8 : vector<8x256xf32>
    %11 = arith.divf %9, %10 : vector<8x256xf32>
    %c1 = arith.constant 1 : index
    %c0_6 = arith.constant 0 : index
    %12 = vector.load %arg3[%c1, %c0_6] : memref<3x256xf32, #tpu.memory_space<vmem>>, vector<1x256xf32>
    %13 = vector.broadcast %12 : vector<1x256xf32> to vector<8x256xf32>
    %14 = arith.mulf %11, %13 : vector<8x256xf32>
    %c2 = arith.constant 2 : index
    %c0_7 = arith.constant 0 : index
    %15 = vector.load %arg3[%c2, %c0_7] : memref<3x256xf32, #tpu.memory_space<vmem>>, vector<1x256xf32>
    %16 = vector.broadcast %15 : vector<1x256xf32> to vector<8x256xf32>
    %17 = arith.addf %14, %16 : vector<8x256xf32>
    %18 = arith.truncf %17 : vector<8x256xf32> to vector<8x256xbf16>
    %c0_8 = arith.constant 0 : index
    %c0_9 = arith.constant 0 : index
    %19 = vector.load %arg4[%c0_8, %c0_9] : memref<256x64xbf16, #tpu.memory_space<vmem>>, vector<256x64xbf16>
    %cst_10 = arith.constant dense<0.000000e+00> : vector<8x64xf32>
    %20 = tpu.matmul %18, %19, %cst_10 {dimension_numbers = #tpu.dot_dimension_numbers<[1], [0], [0], [1], [0, 0, 1, 1], [], []>} : vector<8x256xbf16>, vector<256x64xbf16>, vector<8x64xf32> -> vector<8x64xf32>
    %c0_11 = arith.constant 0 : index
    %c0_12 = arith.constant 0 : index
    %21 = vector.load %arg5[%c0_11, %c0_12] : memref<3x64xf32, #tpu.memory_space<vmem>>, vector<1x64xf32>
    %22 = vector.broadcast %21 : vector<1x64xf32> to vector<8x64xf32>
    %23 = arith.addf %20, %22 : vector<8x64xf32>
    %24 = arith.negf %23 : vector<8x64xf32>
    %25 = math.exp %24 : vector<8x64xf32>
    %cst_13 = arith.constant 1.000000e+00 : f32
    %26 = vector.broadcast %cst_13 : f32 to vector<8x64xf32>
    %27 = arith.addf %26, %25 : vector<8x64xf32>
    %28 = arith.divf %26, %27 : vector<8x64xf32>
    %c1_14 = arith.constant 1 : index
    %c0_15 = arith.constant 0 : index
    %29 = vector.load %arg5[%c1_14, %c0_15] : memref<3x64xf32, #tpu.memory_space<vmem>>, vector<1x64xf32>
    %30 = vector.broadcast %29 : vector<1x64xf32> to vector<8x64xf32>
    %31 = arith.mulf %28, %30 : vector<8x64xf32>
    %c2_16 = arith.constant 2 : index
    %c0_17 = arith.constant 0 : index
    %32 = vector.load %arg5[%c2_16, %c0_17] : memref<3x64xf32, #tpu.memory_space<vmem>>, vector<1x64xf32>
    %33 = vector.broadcast %32 : vector<1x64xf32> to vector<8x64xf32>
    %34 = arith.addf %31, %33 : vector<8x64xf32>
    %c0_18 = arith.constant 0 : index
    %c0_19 = arith.constant 0 : index
    %35 = vector.load %arg6[%c0_18, %c0_19] : memref<64x128xf32, #tpu.memory_space<vmem>>, vector<64x128xf32>
    %cst_20 = arith.constant dense<0.000000e+00> : vector<8x128xf32>
    %36 = tpu.matmul %34, %35, %cst_20 {dimension_numbers = #tpu.dot_dimension_numbers<[1], [0], [0], [1], [0, 0, 1, 1], [], []>} : vector<8x64xf32>, vector<64x128xf32>, vector<8x128xf32> -> vector<8x128xf32>
    %c0_21 = arith.constant 0 : index
    %c0_22 = arith.constant 0 : index
    %37 = vector.load %arg7[%c0_21, %c0_22] : memref<1x128xf32, #tpu.memory_space<vmem>>, vector<1x128xf32>
    %38 = vector.broadcast %37 : vector<1x128xf32> to vector<8x128xf32>
    %39 = arith.addf %36, %38 : vector<8x128xf32>
    %cst_23 = arith.constant 0.000000e+00 : f32
    %40 = vector.broadcast %cst_23 : f32 to vector<8x128xf32>
    %41 = arith.maximumf %39, %40 : vector<8x128xf32>
    %42 = arith.negf %41 : vector<8x128xf32>
    %43 = math.exp %42 : vector<8x128xf32>
    %cst_24 = arith.constant 1.000000e+00 : f32
    %44 = vector.broadcast %cst_24 : f32 to vector<8x128xf32>
    %45 = arith.addf %44, %43 : vector<8x128xf32>
    %46 = arith.divf %44, %45 : vector<8x128xf32>
    %c0_25 = arith.constant 0 : index
    %c0_26 = arith.constant 0 : index
    %47 = vector.load %arg8[%c0_25, %c0_26] : memref<8x128xf32, #tpu.memory_space<vmem>>, vector<8x128xf32>
    tpu.vector_store %arg8[%c0_25, %c0_26], %46 {strides = array<i32>} : memref<8x128xf32, #tpu.memory_space<vmem>>, vector<8x128xf32>,
    return
  }
  func.func @transform_0(%arg0: i32) -> (i32, i32) {
    %c0_i32 = arith.constant 0 : i32
    %c0_i32_0 = arith.constant 0 : i32
    return %arg0, %c0_i32 : i32, i32
  }
  func.func @transform_1(%arg0: i32) -> (i32, i32) {
    %c0_i32 = arith.constant 0 : i32
    %c0_i32_0 = arith.constant 0 : i32
    %c0_i32_1 = arith.constant 0 : i32
    return %c0_i32, %c0_i32_0 : i32, i32
  }
  func.func @transform_2(%arg0: i32) -> (i32, i32) {
    %c0_i32 = arith.constant 0 : i32
    %c0_i32_0 = arith.constant 0 : i32
    %c0_i32_1 = arith.constant 0 : i32
    return %c0_i32, %c0_i32_0 : i32, i32
  }
  func.func @transform_3(%arg0: i32) -> (i32, i32) {
    %c0_i32 = arith.constant 0 : i32
    %c0_i32_0 = arith.constant 0 : i32
    %c0_i32_1 = arith.constant 0 : i32
    return %c0_i32, %c0_i32_0 : i32, i32
  }
  func.func @transform_4(%arg0: i32) -> (i32, i32) {
    %c0_i32 = arith.constant 0 : i32
    %c0_i32_0 = arith.constant 0 : i32
    %c0_i32_1 = arith.constant 0 : i32
    return %c0_i32, %c0_i32_0 : i32, i32
  }
  func.func @transform_5(%arg0: i32) -> (i32, i32) {
    %c0_i32 = arith.constant 0 : i32
    %c0_i32_0 = arith.constant 0 : i32
    %c0_i32_1 = arith.constant 0 : i32
    return %c0_i32, %c0_i32_0 : i32, i32
  }
  func.func @transform_6(%arg0: i32) -> (i32, i32) {
    %c0_i32 = arith.constant 0 : i32
    %c0_i32_0 = arith.constant 0 : i32
    %c0_i32_1 = arith.constant 0 : i32
    return %c0_i32, %c0_i32_0 : i32, i32
  }
  func.func @transform_7(%arg0: i32) -> (i32, i32) {
    %c0_i32 = arith.constant 0 : i32
    %c0_i32_0 = arith.constant 0 : i32
    return %arg0, %c0_i32 : i32, i32
  }
}

</mosaic_0001>

<bundles_post_ra>
// kernel: prefetch_net_forward.1
= control target key start
LH: loop header
LB: loop body
LE: loop exit
PB: predicated region body
PF: predicated region fallthrough
CT: control target
= control target key end

     0   :  { %12 = vsyncpa [#allocation3], 0  ;;  %s1808_s24 = smov [#allocation2]   ;;  %s1986_s0 = inlined_call_operand.vmem [shape: f32[8,1000], index: 0, kind: input, shape index: {}]   ;;  %s1987_s1 = inlined_call_operand.hbm [shape: bf16[1000,256], index: 1, kind: input, shape index: {}]   ;;  %s1988_s2 = inlined_call_operand.vmem [shape: f32[3,256], index: 2, kind: input, shape index: {}]   ;;  %s1989_s3 = inlined_call_operand.vmem [shape: bf16[256,64], index: 3, kind: input, shape index: {}]   ;;  %s1990_s4 = inlined_call_operand.vmem [shape: f32[3,64], index: 4, kind: input, shape index: {}]   ;;  %s1991_s5 = inlined_call_operand.vmem [shape: f32[64,128], index: 5, kind: input, shape index: {}]   ;;  %s1992_s6 = inlined_call_operand.vmem [shape: f32[1,128], index: 6, kind: input, shape index: {}]   ;;  %s1993_s7 = inlined_call_operand.vmem [shape: f32[8,128], index: 7, kind: output, shape index: {}]  }
   0x1   :  { %s20_s25 = sshll.u32 %s1808_s24, 4  ;;  %s1784_s28 = scalar_lea.hbm %s1987_s1, 16000  ;;  %s21_s25 = int_to_ptr.vmem [resolvable:$true] %s20_s25 }
   0x2   :  { %p1785_p0 = scmp.ne.s32.totalorder %s1987_s1, %s1784_s28  ;;  %p1788_p1 = scmp.lt.u32.totalorder %s1784_s28, %s1987_s1 }
   0x4   :  { %p1790_p2 = pnand %p1788_p1, %p1785_p0 }
   0x6   :  { %1793 = shalt.err (!%p1790_p2)
}
   0x7   :  { %s1794_s10 = scalar_lea.vmem %s21_s25, 16000  ;;  %p1799_p4 = scmp.lt.s32.totalorder %s21_s25, %s21_s25 }
   0x8   :  { %p1795_p3 = scmp.ne.s32.totalorder %s21_s25, %s1794_s10  ;;  %p1800_p5 = scmp.lt.s32.totalorder %s1794_s10, %s1794_s10 }
   0xa   :  { %p1801_p6 = por %p1800_p5, %p1799_p4 }
   0xc   :  { %p1802_p7 = pnand %p1801_p6, %p1795_p3 }
   0xe   :  { %1805 = shalt.err (!%p1802_p7)
}
   0xf   :  { %s1809_s11 = smov 128   ;;  %s1810_s12 = smov 8  }
  0x10   :  { %26 = dma.hbm_to_vmem [thread:$0]  %s1987_s1, 16000, %s21_s25, [#allocation3], %s1809_s11, %s1809_s11, %s1810_s12  }
  0x11   :  { %1806 = dma.done.wait [#allocation3], 16000  }
  0x12   :  { %1807 = vsyncadd [#allocation3], 4294951296  ;;  %v1564_v0 = vld [vmem:[#allocation2 + $0x104] ss:$8 sps:$4 sm:$0xff]   ;;  %v1566_v1 = vld [vmem:[#allocation2 + $0x100] ss:$8 sps:$4 sm:$0xff]  }
  0x13   :  { %871 = vmatprep.subr.bf16.mxu0 %v1564_v0  ;;  %v1567_v2 = vld [vmem:[#allocation2 + $0x4] ss:$8 sps:$4 sm:$0xff]   ;;  %v1569_v3 = vld [vmem:[#allocation2] ss:$8 sps:$4 sm:$0xff]   ;;  %v1570_v4 = vld [vmem:[#allocation2 + $0x114] ss:$8 sps:$4 sm:$0xff]  }
  0x14   :  { %872 = vmatpush1.bf16.msra.mxu0 %v1566_v1  ;;  %v1572_v5 = vld [vmem:[#allocation2 + $0x110] ss:$8 sps:$4 sm:$0xff]   ;;  %830 = vmatprep.subr.bf16.mxu1 %v1567_v2  ;;  %v1573_v6 = vld [vmem:[#allocation2 + $0x14] ss:$8 sps:$4 sm:$0xff]   ;;  %v1576_v8 = vld [vmem:[#allocation2 + $0x124] ss:$8 sps:$4 sm:$0xff]  }
  0x15   :  { %831 = vmatpush1.bf16.msra.mxu1 %v1569_v3  ;;  %873 = vmatprep.subr.bf16.mxu0 %v1570_v4  ;;  %v1575_v7 = vld [vmem:[#allocation2 + $0x10] ss:$8 sps:$4 sm:$0xff]   ;;  %v1578_v9 = vld [vmem:[#allocation2 + $0x120] ss:$8 sps:$4 sm:$0xff]   ;;  %v1579_v10 = vld [vmem:[#allocation2 + $0x24] ss:$8 sps:$4 sm:$0xff]  }
  0x16   :  { %832 = vmatprep.subr.bf16.mxu1 %v1573_v6  ;;  %v1582_v11 = vld [vmem:[#allocation2 + $0x134] ss:$8 sps:$4 sm:$0xff]   ;;  %v1581_v12 = vld [vmem:[#allocation2 + $0x20] ss:$8 sps:$4 sm:$0xff]   ;;  %v1584_v14 = vld [vmem:[#allocation2 + $0x130] ss:$8 sps:$4 sm:$0xff]  }
  0x17   :  { %v1585_v13 = vld [vmem:[#allocation2 + $0x34] ss:$8 sps:$4 sm:$0xff]   ;;  %v1588_v15 = vld [vmem:[#allocation2 + $0x144] ss:$8 sps:$4 sm:$0xff]   ;;  %v1587_v16 = vld [vmem:[#allocation2 + $0x30] ss:$8 sps:$4 sm:$0xff]  }
  0x18   :  { %874 = vmatpush1.bf16.msra.mxu0 %v1572_v5  ;;  %v1591_v17 = vld [vmem:[#allocation2 + $0x44] ss:$8 sps:$4 sm:$0xff]   ;;  %v1590_v18 = vld [vmem:[#allocation2 + $0x140] ss:$8 sps:$4 sm:$0xff]   ;;  %v1594_v19 = vld [vmem:[#allocation2 + $0x154] ss:$8 sps:$4 sm:$0xff]  }
  0x19   :  { %875 = vmatprep.subr.bf16.mxu0 %v1576_v8  ;;  %833 = vmatpush1.bf16.msra.mxu1 %v1575_v7  ;;  %v1593_v20 = vld [vmem:[#allocation2 + $0x40] ss:$8 sps:$4 sm:$0xff]   ;;  %v1597_v21 = vld [vmem:[#allocation2 + $0x54] ss:$8 sps:$4 sm:$0xff]   ;;  %v1596_v22 = vld [vmem:[#allocation2 + $0x150] ss:$8 sps:$4 sm:$0xff]  }
  0x1a   :  { %834 = vmatprep.subr.bf16.mxu1 %v1579_v10  ;;  %v1600_v23 = vld [vmem:[#allocation2 + $0x164] ss:$8 sps:$4 sm:$0xff]   ;;  %v1599_v24 = vld [vmem:[#allocation2 + $0x50] ss:$8 sps:$4 sm:$0xff]   ;;  %v1602_v26 = vld [vmem:[#allocation2 + $0x160] ss:$8 sps:$4 sm:$0xff]  }
  0x1b   :  { %v1603_v25 = vld [vmem:[#allocation2 + $0x64] ss:$8 sps:$4 sm:$0xff]   ;;  %v1606_v27 = vld [vmem:[#allocation2 + $0x174] ss:$8 sps:$4 sm:$0xff]   ;;  %v1605_v28 = vld [vmem:[#allocation2 + $0x60] ss:$8 sps:$4 sm:$0xff]  }
  0x1c   :  { %876 = vmatpush1.bf16.msra.mxu0 %v1578_v9  ;;  %v1609_v29 = vld [vmem:[#allocation2 + $0x74] ss:$8 sps:$4 sm:$0xff]   ;;  %v1608_v30 = vld [vmem:[#allocation2 + $0x170] ss:$8 sps:$4 sm:$0xff]   ;;  %v1612_v31 = vld [vmem:[#allocation2 + $0x184] ss:$8 sps:$4 sm:$0xff]  }
  0x1d   :  { %877 = vmatprep.subr.bf16.mxu0 %v1582_v11  ;;  %835 = vmatpush1.bf16.msra.mxu1 %v1581_v12  ;;  %v1611_v32 = vld [vmem:[#allocation2 + $0x70] ss:$8 sps:$4 sm:$0xff]   ;;  %v1615_v33 = vld [vmem:[#allocation2 + $0x84] ss:$8 sps:$4 sm:$0xff]   ;;  %v1614_v34 = vld [vmem:[#allocation2 + $0x180] ss:$8 sps:$4 sm:$0xff]  }
  0x1e   :  { %836 = vmatprep.subr.bf16.mxu1 %v1585_v13  ;;  %v1618_v35 = vld [vmem:[#allocation2 + $0x194] ss:$8 sps:$4 sm:$0xff]   ;;  %v1617_v36 = vld [vmem:[#allocation2 + $0x80] ss:$8 sps:$4 sm:$0xff]   ;;  %v1620_v38 = vld [vmem:[#allocation2 + $0x190] ss:$8 sps:$4 sm:$0xff]  }
  0x1f   :  { %v1621_v37 = vld [vmem:[#allocation2 + $0x94] ss:$8 sps:$4 sm:$0xff]   ;;  %v1624_v39 = vld [vmem:[#allocation2 + $0x1a4] ss:$8 sps:$4 sm:$0xff]   ;;  %v1623_v40 = vld [vmem:[#allocation2 + $0x90] ss:$8 sps:$4 sm:$0xff]  }
  0x20   :  { %878 = vmatpush1.bf16.msra.mxu0 %v1584_v14  ;;  %v1627_v41 = vld [vmem:[#allocation2 + $0xa4] ss:$8 sps:$4 sm:$0xff]   ;;  %v1626_v42 = vld [vmem:[#allocation2 + $0x1a0] ss:$8 sps:$4 sm:$0xff]   ;;  %v1630_v43 = vld [vmem:[#allocation2 + $0x1b4] ss:$8 sps:$4 sm:$0xff]  }
  0x21   :  { %879 = vmatprep.subr.bf16.mxu0 %v1588_v15  ;;  %837 = vmatpush1.bf16.msra.mxu1 %v1587_v16  ;;  %v1629_v44 = vld [vmem:[#allocation2 + $0xa0] ss:$8 sps:$4 sm:$0xff]   ;;  %v1633_v45 = vld [vmem:[#allocation2 + $0xb4] ss:$8 sps:$4 sm:$0xff]   ;;  %v1632_v47 = vld [vmem:[#allocation2 + $0x1b0] ss:$8 sps:$4 sm:$0xff]  }
  0x22   :  { %838 = vmatprep.subr.bf16.mxu1 %v1591_v17  ;;  %v44_v46 = vld [vmem:[%s1986_s0 + $0x18] sm:$0xff]  ;;  %v1636_v49 = vld [vmem:[#allocation2 + $0x1c4] ss:$8 sps:$4 sm:$0xff]   ;;  %v1638_v54 = vld [vmem:[#allocation2 + $0x1c0] ss:$8 sps:$4 sm:$0xff]   ;;  %vm819_vm0 = vcmask 850944  }
  0x23   :  { %v52_v48 = vpack.c.bf16 %v44_v46, %v44_v46  ;;  %v42_v50 = vld [vmem:[%s1986_s0 + $0x8] sm:$0xff]  ;;  %v1635_v51 = vld [vmem:[#allocation2 + $0xb0] ss:$8 sps:$4 sm:$0xff]   ;;  %v1642_v55 = vld [vmem:[#allocation2 + $0x1d4] ss:$8 sps:$4 sm:$0xff]   ;;  %vm823_vm1 = vcmask 1043456  }
  0x24   :  { %880 = vmatpush1.bf16.msra.mxu0 %v1590_v18  ;;  %v50_v52 = vpack.c.bf16 %v42_v50, %v42_v50  ;;  %v1639_v53 = vld [vmem:[#allocation2 + $0xc4] ss:$8 sps:$4 sm:$0xff]   ;;  %v1641_v56 = vld [vmem:[#allocation2 + $0xc0] ss:$8 sps:$4 sm:$0xff]   ;;  %v1645_v57 = vld [vmem:[#allocation2 + $0xd4] ss:$8 sps:$4 sm:$0xff]  }
  0x25   :  { %881 = vmatprep.subr.bf16.mxu0 %v1594_v19  ;;  %839 = vmatpush1.bf16.msra.mxu1 %v1593_v20  ;;  %v1644_v58 = vld [vmem:[#allocation2 + $0x1d0] ss:$8 sps:$4 sm:$0xff]   ;;  %v1648_v59 = vld [vmem:[#allocation2 + $0x1e4] ss:$8 sps:$4 sm:$0xff]   ;;  %v1650_v62 = vld [vmem:[#allocation2 + $0x1e0] ss:$8 sps:$4 sm:$0xff]  }
  0x26   :  { %840 = vmatprep.subr.bf16.mxu1 %v1597_v21  ;;  %903 = vmatprep.mubr.bf16.mxu0 %v52_v48  ;;  %v1647_v60 = vld [vmem:[#allocation2 + $0xd0] ss:$8 sps:$4 sm:$0xff]   ;;  %v1651_v61 = vld [vmem:[#allocation2 + $0xe4] ss:$8 sps:$4 sm:$0xff]   ;;  %v1654_v63 = vld [vmem:[#allocation2 + $0x1f4] ss:$8 sps:$4 sm:$0xff]  }
  0x27   :  { %862 = vmatprep.mubr.bf16.mxu1 %v50_v52  ;;  %v1653_v0 = vld [vmem:[#allocation2 + $0xe0] ss:$8 sps:$4 sm:$0xff]   ;;  %v1656_v1 = vld [vmem:[#allocation2 + $0x1f0] ss:$8 sps:$4 sm:$0xff]   ;;  %v1657_v2 = vld [vmem:[#allocation2 + $0xf4] ss:$8 sps:$4 sm:$0xff]  }
  0x28   :  { %882 = vmatpush1.bf16.msra.mxu0 %v1596_v22  ;;  %v1659_v3 = vld [vmem:[#allocation2 + $0xf0] ss:$8 sps:$4 sm:$0xff]   ;;  %v1662_v5 = vld [vmem:[#allocation2 + $0x204] ss:$8 sps:$4 sm:$0xff]   ;;  %v1660_v9 = vld [vmem:[#allocation2 + $0x200] ss:$8 sps:$4 sm:$0xff]  }
  0x29   :  { %883 = vmatprep.subr.bf16.mxu0 %v1600_v23  ;;  %841 = vmatpush1.bf16.msra.mxu1 %v1599_v24  ;;  %v43_v4 = vld [vmem:[%s1986_s0 + $0x10] sm:$0xff]  ;;  %v41_v6 = vld [vmem:[%s1986_s0] sm:$0xff]  ;;  %vm1812_vm2 = vmmov 0   ;;  %vm1244_vm3 = vcmask 523264  }
  0x2a   :  { %842 = vmatprep.subr.bf16.mxu1 %v1603_v25  ;;  %v51_v7 = vpack.c.bf16 %v43_v4, %v43_v4  ;;  %v1665_v8 = vld [vmem:[#allocation2 + $0x304] ss:$8 sps:$4 sm:$0xff]   ;;  %v49_v10 = vpack.c.bf16 %v41_v6, %v41_v6  ;;  %v1668_v11 = vld [vmem:[#allocation2 + $0x214] ss:$8 sps:$4 sm:$0xff]   ;;  %v1663_v12 = vld [vmem:[#allocation2 + $0x300] ss:$8 sps:$4 sm:$0xff]  }
  0x2b   :  { %v1671_v13 = vld [vmem:[#allocation2 + $0x314] ss:$8 sps:$4 sm:$0xff]   ;;  %v1666_v14 = vld [vmem:[#allocation2 + $0x210] ss:$8 sps:$4 sm:$0xff]   ;;  %v1674_v15 = vld [vmem:[#allocation2 + $0x224] ss:$8 sps:$4 sm:$0xff]  }
  0x2c   :  { %884 = vmatpush1.bf16.msra.mxu0 %v1602_v26  ;;  %v1669_v16 = vld [vmem:[#allocation2 + $0x310] ss:$8 sps:$4 sm:$0xff]   ;;  %v1677_v17 = vld [vmem:[#allocation2 + $0x324] ss:$8 sps:$4 sm:$0xff]   ;;  %v1672_v18 = vld [vmem:[#allocation2 + $0x220] ss:$8 sps:$4 sm:$0xff]  }
  0x2d   :  { %885 = vmatprep.subr.bf16.mxu0 %v1606_v27  ;;  %843 = vmatpush1.bf16.msra.mxu1 %v1605_v28  ;;  %v1680_v19 = vld [vmem:[#allocation2 + $0x234] ss:$8 sps:$4 sm:$0xff]   ;;  %v1675_v20 = vld [vmem:[#allocation2 + $0x320] ss:$8 sps:$4 sm:$0xff]   ;;  %v1678_v22 = vld [vmem:[#allocation2 + $0x230] ss:$8 sps:$4 sm:$0xff]  }
  0x2e   :  { %844 = vmatprep.subr.bf16.mxu1 %v1609_v29  ;;  %v1683_v21 = vld [vmem:[#allocation2 + $0x334] ss:$8 sps:$4 sm:$0xff]   ;;  %v1686_v23 = vld [vmem:[#allocation2 + $0x244] ss:$8 sps:$4 sm:$0xff]   ;;  %v1681_v24 = vld [vmem:[#allocation2 + $0x330] ss:$8 sps:$4 sm:$0xff]  }
  0x2f   :  { %v1689_v25 = vld [vmem:[#allocation2 + $0x344] ss:$8 sps:$4 sm:$0xff]   ;;  %v1684_v26 = vld [vmem:[#allocation2 + $0x240] ss:$8 sps:$4 sm:$0xff]   ;;  %v1692_v27 = vld [vmem:[#allocation2 + $0x254] ss:$8 sps:$4 sm:$0xff]  }
  0x30   :  { %886 = vmatpush1.bf16.msra.mxu0 %v1608_v30  ;;  %v1687_v28 = vld [vmem:[#allocation2 + $0x340] ss:$8 sps:$4 sm:$0xff]   ;;  %v1695_v29 = vld [vmem:[#allocation2 + $0x354] ss:$8 sps:$4 sm:$0xff]   ;;  %v1690_v30 = vld [vmem:[#allocation2 + $0x250] ss:$8 sps:$4 sm:$0xff]  }
  0x31   :  { %887 = vmatprep.subr.bf16.mxu0 %v1612_v31  ;;  %845 = vmatpush1.bf16.msra.mxu1 %v1611_v32  ;;  %v1698_v31 = vld [vmem:[#allocation2 + $0x264] ss:$8 sps:$4 sm:$0xff]   ;;  %v48_v32 = vld [vmem:[%s1986_s0 + $0x38] sm:$0xff]  ;;  %v1708_v46 = vld [vmem:[#allocation2 + $0x280] ss:$8 sps:$4 sm:$0xff]  }
  0x32   :  { %846 = vmatprep.subr.bf16.mxu1 %v1615_v33  ;;  %v46_v33 = vld [vmem:[%s1986_s0 + $0x28] sm:$0xff]  ;;  %v1714_v50 = vld [vmem:[#allocation2 + $0x290] ss:$8 sps:$4 sm:$0xff]  }
  0x33   :  { %v1711_v48 = vld [vmem:[#allocation2 + $0x380] ss:$8 sps:$4 sm:$0xff]   ;;  %v1717_v52 = vld [vmem:[#allocation2 + $0x390] ss:$8 sps:$4 sm:$0xff]   ;;  %v1746_v4 = vld [vmem:[#allocation2 + $0x2e4] ss:$8 sps:$4 sm:$0xff]  }
  0x34   :  { %888 = vmatpush1.bf16.msra.mxu0 %v1614_v34  ;;  %v1693_v34 = vld [vmem:[#allocation2 + $0x350] ss:$8 sps:$4 sm:$0xff]  }
  0x35   :  { %889 = vmatprep.subr.bf16.mxu0 %v1618_v35  ;;  %847 = vmatpush1.bf16.msra.mxu1 %v1617_v36  ;;  %v1696_v35 = vld [vmem:[#allocation2 + $0x260] ss:$8 sps:$4 sm:$0xff]   ;;  %v1701_v36 = vld [vmem:[#allocation2 + $0x364] ss:$8 sps:$4 sm:$0xff]  }
  0x36   :  { %848 = vmatprep.subr.bf16.mxu1 %v1621_v37  ;;  %v56_v37 = vpack.c.bf16 %v48_v32, %v48_v32 }
  0x38   :  { %890 = vmatpush1.bf16.msra.mxu0 %v1620_v38  ;;  %v54_v38 = vpack.c.bf16 %v46_v33, %v46_v33 }
  0x39   :  { %891 = vmatprep.subr.bf16.mxu0 %v1624_v39  ;;  %849 = vmatpush1.bf16.msra.mxu1 %v1623_v40  ;;  %v1704_v39 = vld [vmem:[#allocation2 + $0x274] ss:$8 sps:$4 sm:$0xff]   ;;  %v1699_v40 = vld [vmem:[#allocation2 + $0x360] ss:$8 sps:$4 sm:$0xff]  }
  0x3a   :  { %850 = vmatprep.subr.bf16.mxu1 %v1627_v41  ;;  %v1707_v41 = vld [vmem:[#allocation2 + $0x374] ss:$8 sps:$4 sm:$0xff]  }
  0x3c   :  { %892 = vmatpush1.bf16.msra.mxu0 %v1626_v42  ;;  %v1702_v42 = vld [vmem:[#allocation2 + $0x270] ss:$8 sps:$4 sm:$0xff]  }
  0x3d   :  { %893 = vmatprep.subr.bf16.mxu0 %v1630_v43  ;;  %851 = vmatpush1.bf16.msra.mxu1 %v1629_v44  ;;  %v1710_v43 = vld [vmem:[#allocation2 + $0x284] ss:$8 sps:$4 sm:$0xff]   ;;  %v1705_v44 = vld [vmem:[#allocation2 + $0x370] ss:$8 sps:$4 sm:$0xff]  }
  0x3e   :  { %852 = vmatprep.subr.bf16.mxu1 %v1633_v45  ;;  %v1713_v45 = vld [vmem:[#allocation2 + $0x384] ss:$8 sps:$4 sm:$0xff]  }
  0x40   :  { %894 = vmatpush1.bf16.msra.mxu0 %v1632_v47  ;;  %v1716_v47 = vld [vmem:[#allocation2 + $0x294] ss:$8 sps:$4 sm:$0xff]  }
  0x41   :  { %895 = vmatprep.subr.bf16.mxu0 %v1636_v49  ;;  %853 = vmatpush1.bf16.msra.mxu1 %v1635_v51  ;;  %v1719_v49 = vld [vmem:[#allocation2 + $0x394] ss:$8 sps:$4 sm:$0xff]   ;;  %v1722_v51 = vld [vmem:[#allocation2 + $0x2a4] ss:$8 sps:$4 sm:$0xff]  }
  0x42   :  { %854 = vmatprep.subr.bf16.mxu1 %v1639_v53  ;;  %v1725_v53 = vld [vmem:[#allocation2 + $0x3a4] ss:$8 sps:$4 sm:$0xff]  }
  0x44   :  { %896 = vmatpush1.bf16.msra.mxu0 %v1638_v54  ;;  %v1720_v54 = vld [vmem:[#allocation2 + $0x2a0] ss:$8 sps:$4 sm:$0xff]  }
  0x45   :  { %897 = vmatprep.subr.bf16.mxu0 %v1642_v55  ;;  %855 = vmatpush1.bf16.msra.mxu1 %v1641_v56  ;;  %v1728_v55 = vld [vmem:[#allocation2 + $0x2b4] ss:$8 sps:$4 sm:$0xff]   ;;  %v1723_v56 = vld [vmem:[#allocation2 + $0x3a0] ss:$8 sps:$4 sm:$0xff]  }
  0x46   :  { %856 = vmatprep.subr.bf16.mxu1 %v1645_v57  ;;  %v1731_v57 = vld [vmem:[#allocation2 + $0x3b4] ss:$8 sps:$4 sm:$0xff]  }
  0x48   :  { %898 = vmatpush1.bf16.msra.mxu0 %v1644_v58  ;;  %v1726_v58 = vld [vmem:[#allocation2 + $0x2b0] ss:$8 sps:$4 sm:$0xff]  }
  0x49   :  { %899 = vmatprep.subr.bf16.mxu0 %v1648_v59  ;;  %857 = vmatpush1.bf16.msra.mxu1 %v1647_v60  ;;  %v1734_v59 = vld [vmem:[#allocation2 + $0x2c4] ss:$8 sps:$4 sm:$0xff]   ;;  %v1729_v60 = vld [vmem:[#allocation2 + $0x3b0] ss:$8 sps:$4 sm:$0xff]  }
  0x4a   :  { %858 = vmatprep.subr.bf16.mxu1 %v1651_v61  ;;  %v1737_v61 = vld [vmem:[#allocation2 + $0x3c4] ss:$8 sps:$4 sm:$0xff]  }
  0x4c   :  { %900 = vmatpush1.bf16.msra.mxu0 %v1650_v62  ;;  %v1732_v62 = vld [vmem:[#allocation2 + $0x2c0] ss:$8 sps:$4 sm:$0xff]  }
  0x4d   :  { %901 = vmatprep.subr.bf16.mxu0 %v1654_v63  ;;  %859 = vmatpush1.bf16.msra.mxu1 %v1653_v0  ;;  %v1740_v63 = vld [vmem:[#allocation2 + $0x2d4] ss:$8 sps:$4 sm:$0xff]   ;;  %v1735_v0 = vld [vmem:[#allocation2 + $0x3c0] ss:$8 sps:$4 sm:$0xff]  }
  0x4e   :  { %860 = vmatprep.subr.bf16.mxu1 %v1657_v2  ;;  %v1738_v2 = vld [vmem:[#allocation2 + $0x2d0] ss:$8 sps:$4 sm:$0xff]  }
  0x50   :  { %902 = vmatpush1.bf16.msra.mxu0 %v1656_v1  ;;  %v1743_v1 = vld [vmem:[#allocation2 + $0x3d4] ss:$8 sps:$4 sm:$0xff]  }
  0x51   :  { %912 = vmatprep.subr.bf16.mxu0 %v1662_v5  ;;  %861 = vmatpush1.bf16.msra.mxu1 %v1659_v3  ;;  %v181_v3 = vld [vmem:[#allocation2 + $0x3e0] sm:$0xff]  ;;  %v1741_v5 = vld [vmem:[#allocation2 + $0x3d0] ss:$8 sps:$4 sm:$0xff]  }
  0x52   :  { %953 = vmatprep.subr.bf16.mxu1 %v1665_v8  ;;  %v1456_v6 = vcombine.high %v181_v3, %v181_v3  ;;  %v1744_v8 = vld [vmem:[#allocation2 + $0x2e0] ss:$8 sps:$4 sm:$0xff]  }
  0x53   :  { %904 = vmatmul.mubr.bf16.vlgmr.msra.gmra.mrb[0].mxu0 %v51_v7  ;;  %v1455_v7 = vcombine.low %v181_v3, %v181_v3 }
  0x54   :  { %913 = vmatpush1.bf16.msra.mxu0 %v1660_v9  ;;  %863 = vmatmul.mubr.bf16.vlgmr.msra.gmra.mrb[0].mxu1 %v49_v10  ;;  %v1750_v9 = vld [vmem:[#allocation2 + $0x2f4] ss:$8 sps:$4 sm:$0xff]  }
  0x55   :  { %914 = vmatprep.subr.bf16.mxu0 %v1668_v11  ;;  %954 = vmatpush1.bf16.msra.mxu1 %v1663_v12  ;;  %v47_v10 = vld [vmem:[%s1986_s0 + $0x30] sm:$0xff]  ;;  %v825_v11 = vsel %vm823_vm1, %v1455_v7, 0 }
  0x56   :  { %955 = vmatprep.subr.bf16.mxu1 %v1671_v13  ;;  %1458 = vmatprep.mubr.msk.bf16.mxu1 %vm819_vm0, %v56_v37  ;;  %v1748_v12 = vld [vmem:[#allocation2 + $0x2f0] ss:$8 sps:$4 sm:$0xff]   ;;  %v45_v13 = vld [vmem:[%s1986_s0 + $0x20] sm:$0xff] }
  0x57   :  { %944 = vmatprep.mubr.bf16.mxu0 %v54_v38 }
  0x58   :  { %915 = vmatpush1.bf16.msra.mxu0 %v1666_v14  ;;  %v55_v14 = vpack.c.bf16 %v47_v10, %v47_v10 }
  0x59   :  { %916 = vmatprep.subr.bf16.mxu0 %v1674_v15  ;;  %956 = vmatpush1.bf16.msra.mxu1 %v1669_v16  ;;  %v53_v15 = vpack.c.bf16 %v45_v13, %v45_v13  ;;  %v1752_v16 = vld [vmem:[%s1989_s3 + $0x40] sm:$0xff]  }
  0x5a   :  { %957 = vmatprep.subr.bf16.mxu1 %v1677_v17  ;;  %v1753_v17 = vld [vmem:[%s1989_s3] sm:$0xff]  }
  0x5b   :  { %v1229_v13 = vld [vmem:[%s1991_s5] sm:$0xff] }
  0x5c   :  { %917 = vmatpush1.bf16.msra.mxu0 %v1672_v18  ;;  %v1754_v18 = vld [vmem:[%s1989_s3 + $0x48] sm:$0xff]  }
  0x5d   :  { %918 = vmatprep.subr.bf16.mxu0 %v1680_v19  ;;  %958 = vmatpush1.bf16.msra.mxu1 %v1675_v20  ;;  %v1755_v19 = vld [vmem:[%s1989_s3 + $0x8] sm:$0xff]   ;;  %v1756_v20 = vld [vmem:[%s1989_s3 + $0x50] sm:$0xff]  }
  0x5e   :  { %959 = vmatprep.subr.bf16.mxu1 %v1683_v21  ;;  %v1757_v21 = vld [vmem:[%s1989_s3 + $0x10] sm:$0xff]  }
  0x60   :  { %919 = vmatpush1.bf16.msra.mxu0 %v1678_v22  ;;  %v1758_v22 = vld [vmem:[%s1989_s3 + $0x58] sm:$0xff]  }
  0x61   :  { %920 = vmatprep.subr.bf16.mxu0 %v1686_v23  ;;  %960 = vmatpush1.bf16.msra.mxu1 %v1681_v24  ;;  %v1759_v23 = vld [vmem:[%s1989_s3 + $0x18] sm:$0xff]   ;;  %v1760_v24 = vld [vmem:[%s1989_s3 + $0x60] sm:$0xff]  }
  0x62   :  { %961 = vmatprep.subr.bf16.mxu1 %v1689_v25  ;;  %v1761_v25 = vld [vmem:[%s1989_s3 + $0x20] sm:$0xff]  }
  0x64   :  { %921 = vmatpush1.bf16.msra.mxu0 %v1684_v26  ;;  %v1762_v26 = vld [vmem:[%s1989_s3 + $0x68] sm:$0xff]  }
  0x65   :  { %922 = vmatprep.subr.bf16.mxu0 %v1692_v27  ;;  %962 = vmatpush1.bf16.msra.mxu1 %v1687_v28  ;;  %v1763_v27 = vld [vmem:[%s1989_s3 + $0x28] sm:$0xff]   ;;  %v1764_v28 = vld [vmem:[%s1989_s3 + $0x70] sm:$0xff]  }
  0x66   :  { %963 = vmatprep.subr.bf16.mxu1 %v1695_v29  ;;  %v1765_v29 = vld [vmem:[%s1989_s3 + $0x30] sm:$0xff]  }
  0x68   :  { %923 = vmatpush1.bf16.msra.mxu0 %v1690_v30  ;;  %v1766_v30 = vld [vmem:[%s1989_s3 + $0x78] sm:$0xff]  }
  0x69   :  { %924 = vmatprep.subr.bf16.mxu0 %v1698_v31  ;;  %964 = vmatpush1.bf16.msra.mxu1 %v1693_v34  ;;  %v1767_v31 = vld [vmem:[%s1989_s3 + $0x38] sm:$0xff]  }
  0x6a   :  { %965 = vmatprep.subr.bf16.mxu1 %v1701_v36  ;;  %v184_v36 = vlaneseq }
  0x6c   :  { %925 = vmatpush1.bf16.msra.mxu0 %v1696_v35  ;;  %v185_v37 = vshrl.u32 %v184_v36, 7 }
  0x6d   :  { %926 = vmatprep.subr.bf16.mxu0 %v1704_v39  ;;  %966 = vmatpush1.bf16.msra.mxu1 %v1699_v40  ;;  %v182_v39 = vld [vmem:[%s1988_s2] ss:$4 sm:$0x3] }
  0x6e   :  { %967 = vmatprep.subr.bf16.mxu1 %v1707_v41  ;;  %v186_v38 = vsub.s32 0, %v185_v37  ;;  %v190_v40 = vsub.s32 1, %v185_v37  ;;  %v1481_v37 = vld [vmem:[%s1990_s4 + $0x1] ss:$0 sm:$0xff] }
  0x70   :  { %927 = vmatpush1.bf16.msra.mxu0 %v1702_v42  ;;  %v187_v41 = vrot.slane %v182_v39, %v186_v38  ;;  %v191_v42 = vrot.slane %v182_v39, %v190_v40  ;;  %v1482_v39 = vld [vmem:[%s1990_s4 + $0x2] ss:$0 sm:$0xff] }
  0x71   :  { %928 = vmatprep.subr.bf16.mxu0 %v1710_v43  ;;  %968 = vmatpush1.bf16.msra.mxu1 %v1705_v44 }
  0x72   :  { %969 = vmatprep.subr.bf16.mxu1 %v1713_v45 }
  0x74   :  { %929 = vmatpush1.bf16.msra.mxu0 %v1708_v46 }
  0x75   :  { %930 = vmatprep.subr.bf16.mxu0 %v1716_v47  ;;  %970 = vmatpush1.bf16.msra.mxu1 %v1711_v48 }
  0x76   :  { %971 = vmatprep.subr.bf16.mxu1 %v1719_v49 }
  0x78   :  { %931 = vmatpush1.bf16.msra.mxu0 %v1714_v50 }
  0x79   :  { %932 = vmatprep.subr.bf16.mxu0 %v1722_v51  ;;  %972 = vmatpush1.bf16.msra.mxu1 %v1717_v52 }
  0x7a   :  { %973 = vmatprep.subr.bf16.mxu1 %v1725_v53 }
  0x7c   :  { %933 = vmatpush1.bf16.msra.mxu0 %v1720_v54 }
  0x7d   :  { %934 = vmatprep.subr.bf16.mxu0 %v1728_v55  ;;  %974 = vmatpush1.bf16.msra.mxu1 %v1723_v56 }
  0x7e   :  { %975 = vmatprep.subr.bf16.mxu1 %v1731_v57 }
  0x80   :  { %935 = vmatpush1.bf16.msra.mxu0 %v1726_v58 }
  0x81   :  { %936 = vmatprep.subr.bf16.mxu0 %v1734_v59  ;;  %976 = vmatpush1.bf16.msra.mxu1 %v1729_v60 }
  0x82   :  { %977 = vmatprep.subr.bf16.mxu1 %v1737_v61 }
  0x84   :  { %937 = vmatpush1.bf16.msra.mxu0 %v1732_v62 }
  0x85   :  { %938 = vmatprep.subr.bf16.mxu0 %v1740_v63  ;;  %978 = vmatpush1.bf16.msra.mxu1 %v1735_v0  ;;  %v1461_v63 = vld [vmem:[%s1988_s2 + $0x1] ss:$4 sm:$0x3]  ;;  %v1462_v0 = vld [vmem:[%s1988_s2 + $0x2] ss:$4 sm:$0x3] }
  0x86   :  { %979 = vmatprep.subr.bf16.mxu1 %v1743_v1  ;;  %v1012_v1 = vrot.slane %v1461_v63, %v186_v38  ;;  %v1027_v3 = vrot.slane %v1462_v0, %v186_v38 }
  0x88   :  { %939 = vmatpush1.bf16.msra.mxu0 %v1738_v2  ;;  %v1016_v2 = vrot.slane %v1461_v63, %v190_v40 }
  0x89   :  { %940 = vmatprep.subr.bf16.mxu0 %v1746_v4  ;;  %980 = vmatpush1.bf16.msra.mxu1 %v1741_v5  ;;  %v1031_v5 = vrot.slane %v1462_v0, %v190_v40 }
  0x8a   :  { %1457 = vmatprep.subr.msk.bf16.mxu1 %vm823_vm1, %v1456_v6 }
  0x8c   :  { %941 = vmatpush1.bf16.msra.mxu0 %v1744_v8 }
  0x8d   :  { %942 = vmatprep.subr.bf16.mxu0 %v1750_v9  ;;  %982 = vmatpush1.bf16.msra.mxu1 %v825_v11 }
  0x8e   :  { %1486 = vmatprep.subr.bf16.mxu1 %v1752_v16  ;;  %v1811_v16 = vmov 0.0|0.0  }
  0x90   :  { %943 = vmatpush1.bf16.msra.mxu0 %v1748_v12  ;;  %986 = vmatmul.mubr.bf16.vlgmr.msra.gmra.mrb[4].mxu1 %v55_v14  ;;  %v1230_v14 = vld [vmem:[%s1991_s5 + $0x8] sm:$0xff] }
  0x91   :  { %1487 = vmatpush3.bf16.msra.mxu1 %v1753_v17  ;;  %1536 = vmatprep.subr.bf16.mxu0 %v1811_v16  ;;  %v1231_v17 = vld [vmem:[%s1991_s5 + $0x10] sm:$0xff] }
  0x92   :  { %1488 = vmatprep.subr.bf16.mxu1 %v1754_v18  ;;  %v1232_v18 = vld [vmem:[%s1991_s5 + $0x18] sm:$0xff] }
  0x93   :  { %945 = vmatmul.mubr.bf16.vlgmr.msra.gmra.mrb[0].mxu0 %v53_v15  ;;  %v1537_v15 = vpack.c.bf16 %v1230_v14, %v1229_v13 }
  0x95   :  { %1489 = vmatpush3.bf16.msra.mxu1 %v1755_v19  ;;  %1538 = vmatpush3.bf16.msra.mxu0 %v1537_v15  ;;  %v1540_v19 = vpack.c.bf16 %v1232_v18, %v1231_v17 }
  0x96   :  { %1490 = vmatprep.subr.bf16.mxu1 %v1756_v20  ;;  %1539 = vmatprep.subr.bf16.mxu0 %v1811_v16  ;;  %v1233_v20 = vld [vmem:[%s1991_s5 + $0x20] sm:$0xff] }
  0x99   :  { %1491 = vmatpush3.bf16.msra.mxu1 %v1757_v21  ;;  %v1234_v21 = vld [vmem:[%s1991_s5 + $0x28] sm:$0xff]  ;;  %1541 = vmatpush3.bf16.msra.mxu0 %v1540_v19 }
  0x9a   :  { %1492 = vmatprep.subr.bf16.mxu1 %v1758_v22  ;;  %v1813_v22 = vmov 0.0   ;;  %1542 = vmatprep.subr.bf16.mxu0 %v1811_v16 }
  0x9b   :  { %1533 = vmatprep.mubr.msk.f32.mxu0 %vm1812_vm2, %v1813_v22 }
  0x9d   :  { %1493 = vmatpush3.bf16.msra.mxu1 %v1759_v23  ;;  %v1543_v23 = vpack.c.bf16 %v1234_v21, %v1233_v20 }
  0x9e   :  { %1494 = vmatprep.subr.bf16.mxu1 %v1760_v24  ;;  %v1235_v24 = vld [vmem:[%s1991_s5 + $0x30] sm:$0xff] }
  0x9f   :  { %1544 = vmatpush3.bf16.msra.mxu0 %v1543_v23 }
  0xa0   :  { %1545 = vmatprep.subr.bf16.mxu0 %v1811_v16 }
  0xa1   :  { %1495 = vmatpush3.bf16.msra.mxu1 %v1761_v25  ;;  %v1236_v25 = vld [vmem:[%s1991_s5 + $0x38] sm:$0xff] }
  0xa2   :  { %1496 = vmatprep.subr.bf16.mxu1 %v1762_v26  ;;  %v1546_v26 = vpack.c.bf16 %v1236_v25, %v1235_v24 }
  0xa4   :  { %1547 = vmatpush3.bf16.msra.mxu0 %v1546_v26 }
  0xa5   :  { %1497 = vmatpush3.bf16.msra.mxu1 %v1763_v27 }
  0xa6   :  { %1498 = vmatprep.subr.bf16.mxu1 %v1764_v28  ;;  %v1463_v28 = vld [vmem:[%s1990_s4] ss:$0 sm:$0xff] }
  0xa9   :  { %1499 = vmatpush3.bf16.msra.mxu1 %v1765_v29 }
  0xaa   :  { %1500 = vmatprep.subr.bf16.mxu1 %v1766_v30 }
  0xad   :  { %1501 = vmatpush3.bf16.msra.mxu1 %v1767_v31 }
 0x127   :  { %v864_v32 = vpop.f32.mrb[0].mxu1 }
 0x128   :  { %v866_v33 = vpop.f32.mrb[1].mxu1  ;;  %v865_v44 = vadd.f32 %v864_v32, %v187_v41 }
 0x129   :  { %v868_v34 = vpop.f32.mrb[2].mxu1  ;;  %v867_v46 = vadd.f32 %v866_v33, %v191_v42  ;;  %v1483_v42 = vld [vmem:[%s1992_s6] ss:$0 sm:$0xff] }
 0x12a   :  { %v869_v35 = vpop.f32.mrb[3].mxu1 }
 0x163   :  { %v987_v43 = vpop.f32.mrb[4].mxu1 }
 0x164   :  { %v989_v45 = vpop.f32.mrb[5].mxu1 }
 0x165   :  { %v991_v48 = vpop.f32.mrb[6].mxu1 }
 0x166   :  { %v946_v47 = vpop.f32.mrb[0].mxu0  ;;  %v992_v51 = vpop.f32.mrb[7].mxu1 }
 0x167   :  { %v1549_v49 = vadd.f32 %v946_v47, %v865_v44  ;;  %v948_v50 = vpop.f32.mrb[1].mxu0 }
 0x168   :  { %v1552_v52 = vadd.f32 %v948_v50, %v867_v46  ;;  %v950_v53 = vpop.f32.mrb[2].mxu0 }
 0x169   :  { %v1550_v54 = vadd.f32 %v1549_v49, %v987_v43  ;;  %v951_v55 = vpop.f32.mrb[3].mxu0 }
 0x16a   :  { %v1553_v56 = vadd.f32 %v1552_v52, %v989_v45 }
 0x16b   :  { %v1459_v57 = vmul.f32 -1.442695, %v1550_v54 }
 0x16c   :  { %v1460_v58 = vmul.f32 -1.442695, %v1553_v56 }
 0x16d   :  { %1768 = vpow2.f32 %v1459_v57 }
 0x16e   :  { %1770 = vpow2.f32 %v1460_v58 }
 0x177   :  { %v1769_v59 = vpop.eup %1768 }
 0x178   :  { %v1771_v60 = vpop.eup %1770  ;;  %v1000_v61 = vadd.f32 1.0, %v1769_v59 }
 0x179   :  { %v1001_v62 = vadd.f32 1.0, %v1771_v60 }
 0x17a   :  { %1772 = vrcp.f32 %v1000_v61 }
 0x17b   :  { %1774 = vrcp.f32 %v1001_v62 }
 0x184   :  { %v1773_v4 = vpop.eup %1772 }
 0x185   :  { %v1775_v6 = vpop.eup %1774  ;;  %v1019_v7 = vmul.f32 %v1773_v4, %v1012_v1 }
 0x186   :  { %v1020_v8 = vmul.f32 %v1775_v6, %v1016_v2 }
 0x187   :  { %v1034_v9 = vadd.f32 %v1027_v3, %v1019_v7 }
 0x188   :  { %v1035_v10 = vadd.f32 %v1031_v5, %v1020_v8 }
 0x189   :  { %v1036_v12 = vpack.c.bf16 %v1034_v9, %v1034_v9 }
 0x18a   :  { %v1037_v11 = vpack.c.bf16 %v1035_v10, %v1035_v10 }
 0x18c   :  { %1203 = vmatprep.mubr.bf16.mxu1 %v1037_v11 }
 0x18d   :  { %1204 = vmatmul.mubr.bf16.vlgmr.msra.gmra.mrb[8].mxu1 %v1036_v12 }
 0x260   :  { %v1502_v27 = vpop.f32.mrb[8].mxu1 }
 0x261   :  { %v1503_v29 = vpop.f32.mrb[9].mxu1 }
 0x262   :  { %v1504_v30 = vadd.f32 %v1503_v29, %v1502_v27  ;;  %v1505_v31 = vpop.f32.mrb[10].mxu1 }
 0x263   :  { %v1506_v32 = vpop.f32.mrb[11].mxu1 }
 0x264   :  { %v1206_v33 = vadd.f32 %v1504_v30, %v1463_v28 }
 0x266   :  { %v1480_v34 = vmul.f32 -1.442695, %v1206_v33 }
 0x268   :  { %1776 = vpow2.f32 %v1480_v34 }
 0x272   :  { %v1777_v35 = vpop.eup %1776 }
 0x273   :  { %v1214_v36 = vadd.f32 1.0, %v1777_v35 }
 0x275   :  { %1778 = vrcp.f32 %v1214_v36 }
 0x27f   :  { %v1779_v38 = vpop.eup %1778 }
 0x280   :  { %v1222_v40 = vmul.f32 %v1779_v38, %v1481_v37 }
 0x282   :  { %v1228_v41 = vadd.f32 %v1482_v39, %v1222_v40 }
 0x284   :  { %1534 = vmatmul.mubr.msk.f32.vlgmr.msra.gmra.mrb[4].mxu0 %vm1244_vm3, %v1228_v41 }
 0x357   :  { %v1314_v43 = vpop.f32.mrb[4].mxu0 }
 0x358   :  { %v1315_v44 = vadd.f32 %v1483_v42, %v1314_v43  ;;  %v1535_v45 = vpop.f32.mrb[5].mxu0 }
 0x35a   :  { %v1318_v46 = vmax.f32 %v1315_v44, 0.0 }
 0x35c   :  { %v1485_v47 = vmul.f32 -1.442695, %v1318_v46 }
 0x35e   :  { %1780 = vpow2.f32 %v1485_v47 }
 0x368   :  { %v1781_v48 = vpop.eup %1780 }
 0x369   :  { %v1322_v49 = vadd.f32 1.0, %v1781_v48 }
 0x36b   :  { %1782 = vrcp.f32 %v1322_v49 }
 0x375   :  { %v1783_v50 = vpop.eup %1782 }
 0x376   :  { %1325 = vst [vmem:[%s1993_s7] sm:$0xff] %v1783_v50 }
 0x377   :  { %1330 = vsyncpa [#allocation3], 1 }

</bundles_post_ra>
